<compile_context>
chip_gen: v7x
topology: tpu7x:2x2x1
jax: 0.10.0
libtpu: 0.0.40
codegen_flags: <defaults>
</compile_context>

<pallas_src>
import jax
import jax.numpy as jnp
from jax.experimental import pallas as pl
from jax.experimental.pallas import tpu as pltpu


F_PAD = 128     # padded hidden width (lane-dense)
IN_PAD = 16     # padded input-feature width (9 -> 16)
Q_PAD = 16      # padded q-value rows in the transposed output (9 -> 16)
TB_MAX = 2048   # max batch-tile rows (fits v5e 16 MiB scoped VMEM / v7x VMEM)


def dqn_kernel(x_ref, w_ref, b_ref, out_t_ref, x16_ref):
    # x_ref:     (TB, 9)        f32   -- raw input rows (contiguous 36 B/row DMA)
    # w_ref:     (3, 128, 128)  bf16  -- resident: W1, W2 (in,out); W3^T (+b3 col 127)
    # b_ref:     (8, 128)       f32   -- resident: rows 0/1 are b1/b2
    # out_t_ref: (16, TB)       f32   -- q-values transposed: rows 0..8 valid
    # x16_ref:   (TB, 16)       f32   -- scratch: input zero-extended to 16 lanes

    # Zero-extend 9 -> 16 lanes (padded lanes hit zero weight rows, so the math
    # is exact), then cast to bf16 for the MXU.  Cheap VPU/store-slot work.
    x16_ref[...] = jnp.zeros_like(x16_ref)
    x16_ref[:, :9] = x_ref[...]
    x = x16_ref[...].astype(jnp.bfloat16)                      # (TB, 16)

    w1 = w_ref[0, :IN_PAD, :]                                  # (16, 128) bf16
    w2 = w_ref[1]                                              # (128, 128) bf16
    w3t = w_ref[2, :Q_PAD, :]                                  # (16, 128) bf16 = W3^T (+b3)
    b1 = b_ref[0:1, :]                                         # (1, 128) f32
    b2 = b_ref[1:2, :]

    # fc1 + ReLU  (bf16 MXU matmul, f32 accumulate)
    h1 = jnp.dot(x, w1, preferred_element_type=jnp.float32) + b1
    h1 = jnp.maximum(h1, 0.0).astype(jnp.bfloat16)             # (TB, 128)

    # fc2 + ReLU; lane 127 forced to 1.0 so W3^T's column 127 contributes b3.
    h2 = jnp.dot(h1, w2, preferred_element_type=jnp.float32) + b2
    h2 = jnp.maximum(h2, 0.0)
    lane = jax.lax.broadcasted_iota(jnp.int32, h2.shape, 1)
    h2 = jnp.where(lane == F_PAD - 1, 1.0, h2).astype(jnp.bfloat16)

    # fc3 directly in batch-on-lanes (transposed) form: contract the 128-wide
    # hidden dim of both operands -> (16, TB).  Single unmasked lane-dense
    # store, 8x fewer HBM bytes than a (TB, 128) f32 output.
    q_t = jax.lax.dot_general(
        w3t, h2, (((1,), (1,)), ((), ())),
        preferred_element_type=jnp.float32)
    out_t_ref[...] = q_t


def pack_params(params):
    """Pack (w1,b1,w2,b2,w3,b3) into one bf16 weight slab + one f32 bias slab.

    Zero padding keeps the math exact: padded input lanes hit zero weight rows,
    padded output lanes get zero weight columns + zero bias -> stay zero
    through ReLU and contribute nothing downstream.  fc3 is stored transposed
    (out, in) with b3 folded into column 127 (multiplied by the constant-1
    lane the kernel injects into h2).
    """
    w1, b1, w2, b2, w3, b3 = params
    w_slab = jnp.zeros((3, F_PAD, F_PAD), jnp.bfloat16)
    w_slab = w_slab.at[0, :9, :64].set(w1.astype(jnp.bfloat16))
    w_slab = w_slab.at[1, :64, :32].set(w2.astype(jnp.bfloat16))
    w_slab = w_slab.at[2, :9, :32].set(w3.T.astype(jnp.bfloat16))
    w_slab = w_slab.at[2, :9, F_PAD - 1].set(b3.reshape(-1).astype(jnp.bfloat16))

    b_slab = jnp.zeros((8, F_PAD), jnp.float32)
    b_slab = b_slab.at[0, :64].set(b1.reshape(-1).astype(jnp.float32))
    b_slab = b_slab.at[1, :32].set(b2.reshape(-1).astype(jnp.float32))
    return w_slab, b_slab


def _round_up(n, m):
    return -(-n // m) * m


def _pick_tb(batch, tb_max=TB_MAX):
    """Batch-tile rows: as large as possible (amortizes ~0.35us/grid-step
    overhead) while keeping >= 2 grid steps when the batch allows, so the
    'parallel' axis can span both TensorCores on v7x."""
    if batch <= 256:
        return 128
    half = -(-batch // 2)                   # cdiv(batch, 2)
    return min(tb_max, _round_up(half, 128))


def dqn_forward_packed(x, w_slab, b_slab, *, tb=None):
    """x: (B, 9) f32 -> (16, B_pad) f32 transposed q-values.

    Rows 0..8 are the q-values, columns 0..B-1 the batch.  Returning the packed
    slab lets the consumer fuse the final slice/transpose (or an in-graph
    argmax for greedy action selection) instead of paying a separate HBM pass.
    """
    B, F = x.shape
    assert F == 9, f"expected 9 input features, got {F}"
    if tb is None:
        tb = _pick_tb(B)
    n_tiles = pl.cdiv(B, tb)
    B_pad = n_tiles * tb
    # Tiny batch-only pad (36 B/row) so every tile is full; no feature padding
    # and no bf16 slab materialization in HBM.
    x_p = x if B_pad == B else jnp.pad(x, ((0, B_pad - B), (0, 0)))

    return pl.pallas_call(
        dqn_kernel,
        out_shape=jax.ShapeDtypeStruct((Q_PAD, B_pad), jnp.float32),
        grid_spec=pltpu.PrefetchScalarGridSpec(
            num_scalar_prefetch=0,
            grid=(n_tiles,),
            in_specs=[
                pl.BlockSpec((tb, 9), lambda i: (i, 0)),              # x: streamed, 36 B/row
                pl.BlockSpec((3, F_PAD, F_PAD), lambda i: (0, 0, 0)),  # weights: resident
                pl.BlockSpec((8, F_PAD), lambda i: (0, 0)),            # biases: resident
            ],
            out_specs=pl.BlockSpec((Q_PAD, tb), lambda i: (0, i)),     # transposed q-values
            scratch_shapes=[pltpu.VMEM((tb, IN_PAD), jnp.float32)],
        ),
        compiler_params=pltpu.CompilerParams(
            # Batch axis is independent -> pipelined (double-buffered) and
            # sharded across the two TensorCores on v7x; harmless on v5e/v6e.
            dimension_semantics=("parallel",),
        ),
    )(x_p, w_slab, b_slab)


def dqn_forward(x, w_slab, b_slab, *, tb=None):
    """Convenience wrapper returning PyTorch-shaped (B, 9) f32 q-values."""
    B = x.shape[0]
    out_t = dqn_forward_packed(x, w_slab, b_slab, tb=tb)
    return out_t[:9, :B].T


def init_params(key):
    """Deterministic init mimicking PyTorch Linear default U[-1/sqrt(in), 1/sqrt(in)]."""
    dims = [(9, 64), (64, 32), (32, 9)]
    params = []
    for i, (fan_in, fan_out) in enumerate(dims):
        kw, kb = jax.random.split(jax.random.fold_in(key, i))
        bound = 1.0 / jnp.sqrt(jnp.float32(fan_in))
        w = jax.random.uniform(kw, (fan_in, fan_out), jnp.float32, -bound, bound)
        b = jax.random.uniform(kb, (1, fan_out), jnp.float32, -bound, bound)
        params += [w, b]
    return tuple(params)


def dqn_reference_f32(x, params):
    """Pure f32 reference (matches PyTorch semantics)."""
    w1, b1, w2, b2, w3, b3 = params
    h1 = jnp.maximum(x @ w1 + b1, 0.0)
    h2 = jnp.maximum(h1 @ w2 + b2, 0.0)
    return h2 @ w3 + b3


def dqn_reference_bf16(x, params):
    """Reference mimicking the kernel's matmul math: bf16 operands, f32 accumulate."""
    w1, b1, w2, b2, w3, b3 = params
    bf = lambda a: a.astype(jnp.bfloat16).astype(jnp.float32)
    h1 = jnp.maximum(bf(x) @ bf(w1) + b1, 0.0)
    h2 = jnp.maximum(bf(h1) @ bf(w2) + b2, 0.0)
    return bf(h2) @ bf(w3) + b3


if __name__ == "__main__":
    key = jax.random.PRNGKey(0)
    kx, kp = jax.random.split(key)

    # Small batch of flattened 3x3 board states (9 features each).
    # Non-multiple of the batch tile to exercise padding + a 2-step grid
    # (also what v7x needs to use both TensorCores).
    B = 200
    x = jax.random.normal(kx, (B, 9), jnp.float32)
    params = init_params(kp)
    w_slab, b_slab = pack_params(params)

    out = jax.block_until_ready(dqn_forward(x, w_slab, b_slab))

    ref_bf16 = dqn_reference_bf16(x, params)
    ref_f32 = dqn_reference_f32(x, params)

    assert out.shape == (B, 9), out.shape
    # Tight check vs. a reference that mimics the kernel's bf16-operand math.
    assert jnp.allclose(out, ref_bf16, atol=1e-2, rtol=1e-2), "mismatch vs bf16 reference"
    # Loose sanity check vs. the pure-f32 PyTorch-equivalent reference.
    assert jnp.allclose(out, ref_f32, atol=7e-2, rtol=7e-2), "mismatch vs f32 reference"

    print("KERNEL_OK")
</pallas_src>

<mosaic_0001>
module attributes {stable_mosaic.version = 11 : i64} {
  func.func @dqn_kernel(%arg0: i32, %arg1: memref<128x9xf32, #tpu.memory_space<vmem>>, %arg2: memref<3x128x128xbf16, #tpu.memory_space<vmem>>, %arg3: memref<8x128xf32, #tpu.memory_space<vmem>>, %arg4: memref<16x128xf32, #tpu.memory_space<vmem>>, %arg5: memref<128x16xf32, #tpu.memory_space<vmem>>) attributes {dimension_semantics = [#tpu.dimension_semantics<parallel>], iteration_bounds = array<i64: 2>, scalar_prefetch = 0 : i64, scratch_operands = 1 : i64, tpu.core_type = #tpu.core_type<tc>, window_params = [{transform_indices = @transform_0, window_bounds = array<i64: 128, 9>}, {pipeline_mode = #tpu.pipeline_mode<synchronous>, transform_indices = @transform_1, window_bounds = array<i64: 3, 128, 128>}, {pipeline_mode = #tpu.pipeline_mode<synchronous>, transform_indices = @transform_2, window_bounds = array<i64: 8, 128>}, {transform_indices = @transform_3, window_bounds = array<i64: 16, 128>}]} {
    %cst = arith.constant 0.000000e+00 : f32
    %0 = vector.broadcast %cst : f32 to vector<128x16xf32>
    %c0 = arith.constant 0 : index
    %c0_0 = arith.constant 0 : index
    %1 = vector.load %arg5[%c0, %c0_0] : memref<128x16xf32, #tpu.memory_space<vmem>>, vector<128x16xf32>
    tpu.vector_store %arg5[%c0, %c0_0], %0 {strides = array<i32>} : memref<128x16xf32, #tpu.memory_space<vmem>>, vector<128x16xf32>,
    %c0_1 = arith.constant 0 : index
    %c0_2 = arith.constant 0 : index
    %2 = vector.load %arg1[%c0_1, %c0_2] : memref<128x9xf32, #tpu.memory_space<vmem>>, vector<128x9xf32>
    %c0_3 = arith.constant 0 : index
    %c0_4 = arith.constant 0 : index
    %3 = vector.load %arg5[%c0_3, %c0_4] : memref<128x16xf32, #tpu.memory_space<vmem>>, vector<128x9xf32>
    tpu.vector_store %arg5[%c0_3, %c0_4], %2 {strides = array<i32>} : memref<128x16xf32, #tpu.memory_space<vmem>>, vector<128x9xf32>,
    %c0_5 = arith.constant 0 : index
    %c0_6 = arith.constant 0 : index
    %4 = vector.load %arg5[%c0_5, %c0_6] : memref<128x16xf32, #tpu.memory_space<vmem>>, vector<128x16xf32>
    %5 = arith.truncf %4 : vector<128x16xf32> to vector<128x16xbf16>
    %c0_7 = arith.constant 0 : index
    %c0_8 = arith.constant 0 : index
    %c0_9 = arith.constant 0 : index
    %6 = vector.load %arg2[%c0_7, %c0_8, %c0_9] : memref<3x128x128xbf16, #tpu.memory_space<vmem>>, vector<1x16x128xbf16>
    %7 = vector.shape_cast %6 : vector<1x16x128xbf16> to vector<16x128xbf16>
    %c1 = arith.constant 1 : index
    %c0_10 = arith.constant 0 : index
    %c0_11 = arith.constant 0 : index
    %8 = vector.load %arg2[%c1, %c0_10, %c0_11] : memref<3x128x128xbf16, #tpu.memory_space<vmem>>, vector<1x128x128xbf16>
    %9 = vector.shape_cast %8 : vector<1x128x128xbf16> to vector<128x128xbf16>
    %c2 = arith.constant 2 : index
    %c0_12 = arith.constant 0 : index
    %c0_13 = arith.constant 0 : index
    %10 = vector.load %arg2[%c2, %c0_12, %c0_13] : memref<3x128x128xbf16, #tpu.memory_space<vmem>>, vector<1x16x128xbf16>
    %11 = vector.shape_cast %10 : vector<1x16x128xbf16> to vector<16x128xbf16>
    %c0_14 = arith.constant 0 : index
    %c0_15 = arith.constant 0 : index
    %12 = vector.load %arg3[%c0_14, %c0_15] : memref<8x128xf32, #tpu.memory_space<vmem>>, vector<1x128xf32>
    %c1_16 = arith.constant 1 : index
    %c0_17 = arith.constant 0 : index
    %13 = vector.load %arg3[%c1_16, %c0_17] : memref<8x128xf32, #tpu.memory_space<vmem>>, vector<1x128xf32>
    %cst_18 = arith.constant dense<0.000000e+00> : vector<128x128xf32>
    %14 = tpu.matmul %5, %7, %cst_18 {dimension_numbers = #tpu.dot_dimension_numbers<[1], [0], [0], [1], [0, 0, 1, 1], [], []>} : vector<128x16xbf16>, vector<16x128xbf16>, vector<128x128xf32> -> vector<128x128xf32>
    %15 = vector.broadcast %12 : vector<1x128xf32> to vector<128x128xf32>
    %16 = arith.addf %14, %15 : vector<128x128xf32>
    %cst_19 = arith.constant 0.000000e+00 : f32
    %17 = vector.broadcast %cst_19 : f32 to vector<128x128xf32>
    %18 = arith.maximumf %16, %17 : vector<128x128xf32>
    %19 = arith.truncf %18 : vector<128x128xf32> to vector<128x128xbf16>
    %cst_20 = arith.constant dense<0.000000e+00> : vector<128x128xf32>
    %20 = tpu.matmul %19, %9, %cst_20 {dimension_numbers = #tpu.dot_dimension_numbers<[1], [0], [0], [1], [0, 0, 1, 1], [], []>} : vector<128x128xbf16>, vector<128x128xbf16>, vector<128x128xf32> -> vector<128x128xf32>
    %21 = vector.broadcast %13 : vector<1x128xf32> to vector<128x128xf32>
    %22 = arith.addf %20, %21 : vector<128x128xf32>
    %cst_21 = arith.constant 0.000000e+00 : f32
    %23 = vector.broadcast %cst_21 : f32 to vector<128x128xf32>
    %24 = arith.maximumf %22, %23 : vector<128x128xf32>
    %25 = tpu.iota {dimensions = array<i32: 1>} : vector<128x128xi32>
    %c127_i32 = arith.constant 127 : i32
    %26 = vector.broadcast %c127_i32 : i32 to vector<128x128xi32>
    %27 = arith.cmpi eq, %25, %26 : vector<128x128xi32>
    %cst_22 = arith.constant 1.000000e+00 : f32
    %28 = vector.broadcast %cst_22 : f32 to vector<128x128xf32>
    %29 = arith.select %27, %28, %24 : vector<128x128xi1>, vector<128x128xf32>
    %30 = arith.truncf %29 : vector<128x128xf32> to vector<128x128xbf16>
    %cst_23 = arith.constant dense<0.000000e+00> : vector<16x128xf32>
    %31 = tpu.matmul %11, %30, %cst_23 {dimension_numbers = #tpu.dot_dimension_numbers<[1], [1], [0], [0], [0, 0, 1, 0], [], []>} : vector<16x128xbf16>, vector<128x128xbf16>, vector<16x128xf32> -> vector<16x128xf32>
    %c0_24 = arith.constant 0 : index
    %c0_25 = arith.constant 0 : index
    %32 = vector.load %arg4[%c0_24, %c0_25] : memref<16x128xf32, #tpu.memory_space<vmem>>, vector<16x128xf32>
    tpu.vector_store %arg4[%c0_24, %c0_25], %31 {strides = array<i32>} : memref<16x128xf32, #tpu.memory_space<vmem>>, vector<16x128xf32>,
    return
  }
  func.func @transform_0(%arg0: i32) -> (i32, i32) {
    %c0_i32 = arith.constant 0 : i32
    %c0_i32_0 = arith.constant 0 : i32
    return %arg0, %c0_i32 : i32, i32
  }
  func.func @transform_1(%arg0: i32) -> (i32, i32, i32) {
    %c0_i32 = arith.constant 0 : i32
    %c0_i32_0 = arith.constant 0 : i32
    %c0_i32_1 = arith.constant 0 : i32
    %c0_i32_2 = arith.constant 0 : i32
    return %c0_i32, %c0_i32_0, %c0_i32_1 : i32, i32, i32
  }
  func.func @transform_2(%arg0: i32) -> (i32, i32) {
    %c0_i32 = arith.constant 0 : i32
    %c0_i32_0 = arith.constant 0 : i32
    %c0_i32_1 = arith.constant 0 : i32
    return %c0_i32, %c0_i32_0 : i32, i32
  }
  func.func @transform_3(%arg0: i32) -> (i32, i32) {
    %c0_i32 = arith.constant 0 : i32
    %c0_i32_0 = arith.constant 0 : i32
    return %c0_i32, %arg0 : i32, i32
  }
}

</mosaic_0001>

<bundles_post_ra>
// kernel: tpu_custom_call.1
= control target key start
LH: loop header
LB: loop body
LE: loop exit
PB: predicated region body
PF: predicated region fallthrough
CT: control target
= control target key end

     0   :  { %8 = vsyncpa [#allocation4], 0  ;;  %s1300_s0 = inlined_call_operand.vmem [shape: f32[256,9], index: 0, kind: input, shape index: {}]   ;;  %s1301_s1 = inlined_call_operand.vmem [shape: bf16[3,128,128], index: 1, kind: input, shape index: {}]   ;;  %s1302_s2 = inlined_call_operand.vmem [shape: f32[8,128], index: 2, kind: input, shape index: {}]   ;;  %s1303_s3 = inlined_call_operand.hbm [shape: f32[16,256], index: 3, kind: output, shape index: {}]  }
   0x1   :  { %10 = vsyncpa [#allocation4 + $0x1], 0  ;;  %s1038_s12 = smov 0   ;;  %s1040_s13 = smov 0  }
   0x2   :  { %s1042_s14 = smov 0   ;;  %s1044_s15 = smov 0  }
   0x3 LB: > { %s1059_s16 = sadd.s32 4294967295, %s1010_s15   ;;  %s741_s17 = sadd.s32 4294967294, %s1010_s15   ;;  %s1010_s15 = sphi %s1044_s15, %s1310_s15   ;;  %s1006_s14 = sphi %s1042_s14, %s1309_s14   ;;  %s1002_s13 = sphi %s1040_s13, %s1308_s13   ;;  %s998_s12 = sphi %s1038_s12, %s1307_s12  }
   0x4   : > { %s1063_s18 = sadd.s32 1, %s1010_s15   ;;  %s91_s19 = sadd.s32 1, %s1006_s14 }
   0x5   : > { %s88_s20 = ssub.s32 %s1010_s15, %s1063_s18  ;;  %p101_p0 = scmp.ne.s32.totalorder %s1006_s14, %s1002_s13 }
   0x6   : > { %p89_p1 = scmp.eq.s32.totalorder %s88_s20, 0  ;;  %p102_p2 = scmp.eq.s32.totalorder %s1059_s16, 1 }
   0x7   : > { %p107_p3 = scmp.ne.s32.totalorder %s1002_s13, %s998_s12  ;;  %p108_p4 = scmp.eq.s32.totalorder %s741_s17, 1 }
   0x8   : > { %s1074_s21 = scalar_select %p89_p1, %s1006_s14, %s91_s19  }
   0x9   : > { %p1076_p5 = por %p102_p2, %p101_p0  ;;  %p1080_p6 = por %p108_p4, %p107_p3 }
   0xa   : > { %p744_p7 = scmp.ge.s32.totalorder %s1010_s15, 1  ;;  %p141_p8 = scmp.lt.s32.totalorder %s1010_s15, 3 }
   0xc   : > { %p142_p9 = pnand %p744_p7, %p141_p8 }
   0xd   : > { %v938_v0 = vld [vmem:[%s1301_s1] sm:$0xff] (!%p142_p9)   ;;  %s746_s26 = sshll.u32 (!%p142_p9), %s1059_s16, 4  ;;  %vm172_vm0 = vcmask (!%p142_p9), 130048   ;;  %v1012_v1 = vmov (!%p142_p9), 0.0   ;;  %vm205_vm1 = vcmask (!%p142_p9), 72704   ;;  %v940_v28 = vld [vmem:[%s1301_s1 + $0x48] sm:$0xff] (!%p142_p9)  }
   0xe   : > { %145 = sbr.rel (%p142_p9) target bundleno = 773 (0x305), region = 32  ;;  %p1090_p10 = scmp.lt.s32.totalorder (!%p142_p9), %s746_s26, 31  ;;  %824 = vmatprep.subr.bf16.mxu1 (!%p142_p9), %v938_v0  ;;  %173 = vst.msk [vmem:[#allocation2] sm:$0xff] (!%p142_p9), %vm172_vm0, %v1012_v1  ;;  %174 = vst.msk [vmem:[#allocation2 + $0x8] sm:$0xff] (!%p142_p9), %vm172_vm0, %v1012_v1  ;;  %v939_v2 = vld [vmem:[%s1301_s1 + $0x40] sm:$0xff] (!%p142_p9)   ;;  %874 = vmatprep.subr.bf16.mxu0 (!%p142_p9), %v1012_v1  ;;  %v941_v33 = vld [vmem:[%s1301_s1 + $0x50] sm:$0xff] (!%p142_p9)  }
   0xf   : > { %175 = vst.msk [vmem:[#allocation2 + $0x10] sm:$0xff] (!%p142_p9), %vm172_vm0, %v1012_v1  ;;  %176 = vst.msk [vmem:[#allocation2 + $0x18] sm:$0xff] (!%p142_p9), %vm172_vm0, %v1012_v1  ;;  %825 = vmatpush3.bf16.msra.mxu1 (!%p142_p9), %v938_v0  ;;  %v942_v36 = vld [vmem:[%s1301_s1 + $0x58] sm:$0xff] (!%p142_p9)   ;;  %v943_v41 = vld [vmem:[%s1301_s1 + $0x60] sm:$0xff] (!%p142_p9)   ;;  %vm1013_vm2 = vmmov (!%p142_p9), 0   ;;  %s162_s9 = sand.u32 (!%p142_p9), 1, %s1002_s13  }
  0x10   : > { %177 = vst.msk [vmem:[#allocation2 + $0x20] sm:$0xff] (!%p142_p9), %vm172_vm0, %v1012_v1  ;;  %178 = vst.msk [vmem:[#allocation2 + $0x28] sm:$0xff] (!%p142_p9), %vm172_vm0, %v1012_v1  ;;  %842 = vmatprep.subr.bf16.mxu1 (!%p142_p9), %v939_v2  ;;  %v944_v44 = vld [vmem:[%s1301_s1 + $0x68] sm:$0xff] (!%p142_p9)   ;;  %v945_v48 = vld [vmem:[%s1301_s1 + $0x70] sm:$0xff] (!%p142_p9)   ;;  %890 = vmatprep.mubr.msk.bf16.mxu0 (!%p142_p9), %vm1013_vm2, %v1012_v1  ;;  %s745_s10 = sshll.u32 (!%p142_p9), %s162_s9, 4  ;;  %s787_s19 = sshll.u32 (!%p142_p9), %s1059_s16, 7 }
  0x11   : > { %179 = vst.msk [vmem:[#allocation2 + $0x30] sm:$0xff] (!%p142_p9), %vm172_vm0, %v1012_v1  ;;  %180 = vst.msk [vmem:[#allocation2 + $0x38] sm:$0xff] (!%p142_p9), %vm172_vm0, %v1012_v1  ;;  %v946_v49 = vld [vmem:[%s1301_s1 + $0x78] sm:$0xff] (!%p142_p9)   ;;  %v766_v50 = vld [vmem:[%s1302_s2] ss:$0 sm:$0xff] (!%p142_p9)  ;;  %s164_s11 = scalar_lea.vmem (!%p142_p9), [#allocation3], %s745_s10  ;;  %s1257_s25 = scalar_lea.hbm (!%p142_p9), %s1303_s3, %s787_s19 }
  0x12   : > { %181 = vst.msk [vmem:[#allocation2 + $0x40] sm:$0xff] (!%p142_p9), %vm172_vm0, %v1012_v1  ;;  %182 = vst.msk [vmem:[#allocation2 + $0x48] sm:$0xff] (!%p142_p9), %vm172_vm0, %v1012_v1  ;;  %s679_s17 = sshll.u32 (!%p142_p9), %s164_s11, 4  ;;  %s1014_s16 = smov (!%p142_p9), [#allocation3]   ;;  %s1252_s17 = int_to_ptr.vmem [resolvable:$true] %s679_s17 }
  0x13   : > { %183 = vst.msk [vmem:[#allocation2 + $0x50] sm:$0xff] (!%p142_p9), %vm172_vm0, %v1012_v1  ;;  %184 = vst.msk [vmem:[#allocation2 + $0x58] sm:$0xff] (!%p142_p9), %vm172_vm0, %v1012_v1  ;;  %s948_s27 = scalar_lea.vmem (!%p142_p9), %s1252_s17, 256  ;;  %s952_s28 = sshll.u32 (!%p142_p9), %s1014_s16, 4  ;;  %s953_s28 = int_to_ptr.vmem [resolvable:$false] %s952_s28 }
  0x14   : > { %185 = vst.msk [vmem:[#allocation2 + $0x60] sm:$0xff] (!%p142_p9), %vm172_vm0, %v1012_v1  ;;  %186 = vst.msk [vmem:[#allocation2 + $0x68] sm:$0xff] (!%p142_p9), %vm172_vm0, %v1012_v1  ;;  %p949_p11 = scmp.ne.s32.totalorder (!%p142_p9), %s1252_s17, %s948_s27  ;;  %s954_s29 = scalar_lea.vmem (!%p142_p9), %s953_s28, 512 }
  0x15   : > { %187 = vst.msk [vmem:[#allocation2 + $0x70] sm:$0xff] %vm172_vm0, %v1012_v1  ;;  %188 = vst.msk [vmem:[#allocation2 + $0x78] sm:$0xff] %vm172_vm0, %v1012_v1  ;;  %s1312_s26 = smov (!%p1090_p10, %s746_s26), 31  ;;  %p955_p0 = scmp.lt.s32.totalorder %s1252_s17, %s953_s28 }
  0x16   : > { %s747_s30 = sshll.u32 %s1312_s26, 3  ;;  %s1259_s26 = scalar_lea.sflag [#allocation4], %s162_s9 }
  0x17   : > { %s169_s6 = scalar_lea.vmem %s1300_s0, %s747_s30  ;;  %p950_p12 = pnand %p949_p11, %p1076_p5 }
  0x18   : > { %v189_v3 = vld [vmem:[%s169_s6] sm:$0xff]  ;;  %v190_v4 = vld [vmem:[%s169_s6 + $0x8] sm:$0xff]  ;;  %v191_v5 = vld [vmem:[%s169_s6 + $0x10] sm:$0xff]  ;;  %p956_p1 = scmp.lt.s32.totalorder %s954_s29, %s948_s27 }
  0x19   : > { %206 = vst.msk [vmem:[#allocation2] sm:$0xff] %vm205_vm1, %v189_v3  ;;  %207 = vst.msk [vmem:[#allocation2 + $0x8] sm:$0xff] %vm205_vm1, %v190_v4  ;;  %v192_v6 = vld [vmem:[%s169_s6 + $0x18] sm:$0xff]  ;;  %v193_v7 = vld [vmem:[%s169_s6 + $0x20] sm:$0xff]  ;;  %p951_p13 = pneg %p950_p12 }
  0x1a   : > { %208 = vst.msk [vmem:[#allocation2 + $0x10] sm:$0xff] %vm205_vm1, %v191_v5  ;;  %v194_v8 = vld [vmem:[%s169_s6 + $0x28] sm:$0xff]  ;;  %209 = vst.msk [vmem:[#allocation2 + $0x18] sm:$0xff] %vm205_vm1, %v192_v6  ;;  %v195_v9 = vld [vmem:[%s169_s6 + $0x30] sm:$0xff]  ;;  %p957_p2 = por %p956_p1, %p955_p0 }
  0x1b   : > { %210 = vst.msk [vmem:[#allocation2 + $0x20] sm:$0xff] %vm205_vm1, %v193_v7  ;;  %211 = vst.msk [vmem:[#allocation2 + $0x28] sm:$0xff] %vm205_vm1, %v194_v8  ;;  %v196_v10 = vld [vmem:[%s169_s6 + $0x38] sm:$0xff]  ;;  %v197_v11 = vld [vmem:[%s169_s6 + $0x40] sm:$0xff] }
  0x1c   : > { %212 = vst.msk [vmem:[#allocation2 + $0x30] sm:$0xff] %vm205_vm1, %v195_v9  ;;  %213 = vst.msk [vmem:[#allocation2 + $0x38] sm:$0xff] %vm205_vm1, %v196_v10  ;;  %v198_v12 = vld [vmem:[%s169_s6 + $0x48] sm:$0xff]  ;;  %v199_v13 = vld [vmem:[%s169_s6 + $0x50] sm:$0xff]  ;;  %p958_p3 = pnand %p957_p2, %p951_p13 }
  0x1d   : > { %214 = vst.msk [vmem:[#allocation2 + $0x40] sm:$0xff] %vm205_vm1, %v197_v11  ;;  %v200_v14 = vld [vmem:[%s169_s6 + $0x58] sm:$0xff]  ;;  %215 = vst.msk [vmem:[#allocation2 + $0x48] sm:$0xff] %vm205_vm1, %v198_v12  ;;  %v201_v15 = vld [vmem:[%s169_s6 + $0x60] sm:$0xff] }
  0x1e   : > { %216 = vst.msk [vmem:[#allocation2 + $0x50] sm:$0xff] %vm205_vm1, %v199_v13  ;;  %217 = vst.msk [vmem:[#allocation2 + $0x58] sm:$0xff] %vm205_vm1, %v200_v14  ;;  %v202_v16 = vld [vmem:[%s169_s6 + $0x68] sm:$0xff]  ;;  %v203_v17 = vld [vmem:[%s169_s6 + $0x70] sm:$0xff] }
  0x1f   : > { %218 = vst.msk [vmem:[#allocation2 + $0x60] sm:$0xff] %vm205_vm1, %v201_v15  ;;  %219 = vst.msk [vmem:[#allocation2 + $0x68] sm:$0xff] %vm205_vm1, %v202_v16  ;;  %v204_v18 = vld [vmem:[%s169_s6 + $0x78] sm:$0xff] }
  0x20   : > { %220 = vst.msk [vmem:[#allocation2 + $0x70] sm:$0xff] %vm205_vm1, %v203_v17  ;;  %221 = vst.msk [vmem:[#allocation2 + $0x78] sm:$0xff] %vm205_vm1, %v204_v18  ;;  %v222_v19 = vld [vmem:[#allocation2] sm:$0xff]  ;;  %v223_v20 = vld [vmem:[#allocation2 + $0x8] sm:$0xff] }
  0x21   : > { %v224_v21 = vld [vmem:[#allocation2 + $0x10] sm:$0xff]  ;;  %v238_v22 = vpack.c.bf16 %v223_v20, %v222_v19  ;;  %v225_v23 = vld [vmem:[#allocation2 + $0x18] sm:$0xff] }
  0x22   : > { %v226_v24 = vld [vmem:[#allocation2 + $0x20] sm:$0xff]  ;;  %v227_v25 = vld [vmem:[#allocation2 + $0x28] sm:$0xff]  ;;  %v239_v26 = vpack.c.bf16 %v225_v23, %v224_v21 }
  0x23   : > { %v240_v27 = vpack.c.bf16 %v227_v25, %v226_v24  ;;  %826 = vmatprep.mubr.msk.bf16.mxu1 %vm172_vm0, %v238_v22  ;;  %v228_v29 = vld [vmem:[#allocation2 + $0x30] sm:$0xff]  ;;  %v229_v30 = vld [vmem:[#allocation2 + $0x38] sm:$0xff] }
  0x24   : > { %827 = vmatmul.mubr.msk.bf16.vlgmr.msra.gmra.mrb[0].mxu1 %vm172_vm0, %v239_v26  ;;  %v230_v31 = vld [vmem:[#allocation2 + $0x40] sm:$0xff]  ;;  %v231_v32 = vld [vmem:[#allocation2 + $0x48] sm:$0xff]  ;;  %v241_v34 = vpack.c.bf16 %v229_v30, %v228_v29 }
  0x25   : > { %830 = vmatprep.mubr.msk.bf16.mxu1 %vm172_vm0, %v240_v27  ;;  %843 = vmatpush3.bf16.msra.mxu1 %v939_v2  ;;  %v242_v35 = vpack.c.bf16 %v231_v32, %v230_v31  ;;  %v232_v37 = vld [vmem:[#allocation2 + $0x50] sm:$0xff]  ;;  %v233_v38 = vld [vmem:[#allocation2 + $0x58] sm:$0xff] }
  0x26   : > { %844 = vmatprep.subr.bf16.mxu1 %v940_v28  ;;  %v234_v39 = vld [vmem:[#allocation2 + $0x60] sm:$0xff]  ;;  %v235_v40 = vld [vmem:[#allocation2 + $0x68] sm:$0xff]  ;;  %v243_v42 = vpack.c.bf16 %v233_v38, %v232_v37 }
  0x27   : > { %v244_v43 = vpack.c.bf16 %v235_v40, %v234_v39  ;;  %v236_v45 = vld [vmem:[#allocation2 + $0x70] sm:$0xff]  ;;  %v237_v46 = vld [vmem:[#allocation2 + $0x78] sm:$0xff] }
  0x28   : > { %v245_v47 = vpack.c.bf16 %v237_v46, %v236_v45  ;;  %v1187_v45 = vld [vmem:[%s1302_s2 + $0x1] ss:$0 sm:$0xff] }
  0x29   : > { %845 = vmatpush3.bf16.msra.mxu1 %v940_v28 }
  0x2a   : > { %846 = vmatprep.subr.bf16.mxu1 %v941_v33 }
  0x2c   : > { %831 = vmatmul.mubr.msk.bf16.gmra.mrb[4].mxu1 %vm172_vm0, %v241_v34 }
  0x2d   : > { %834 = vmatprep.mubr.msk.bf16.mxu1 %vm172_vm0, %v242_v35  ;;  %847 = vmatpush3.bf16.msra.mxu1 %v941_v33 }
  0x2e   : > { %848 = vmatprep.subr.bf16.mxu1 %v942_v36 }
  0x31   : > { %849 = vmatpush3.bf16.msra.mxu1 %v942_v36 }
  0x32   : > { %850 = vmatprep.subr.bf16.mxu1 %v943_v41 }
  0x34   : > { %835 = vmatmul.mubr.msk.bf16.gmra.mrb[8].mxu1 %vm172_vm0, %v243_v42 }
  0x35   : > { %838 = vmatprep.mubr.msk.bf16.mxu1 %vm172_vm0, %v244_v43  ;;  %851 = vmatpush3.bf16.msra.mxu1 %v943_v41 }
  0x36   : > { %852 = vmatprep.subr.bf16.mxu1 %v944_v44 }
  0x39   : > { %853 = vmatpush3.bf16.msra.mxu1 %v944_v44  ;;  %v590_v44 = vlaneseq }
  0x3a   : > { %854 = vmatprep.subr.bf16.mxu1 %v945_v48 }
  0x3c   : > { %839 = vmatmul.mubr.msk.bf16.gmra.mrb[12].mxu1 %vm172_vm0, %v245_v47  ;;  %v1189_v47 = vand.u32 127, %v590_v44 }
  0x3d   : > { %855 = vmatpush3.bf16.msra.mxu1 %v945_v48 }
  0x3e   : > { %856 = vmatprep.subr.bf16.mxu1 %v946_v49  ;;  %vm592_vm3 = vcmp.eq.s32.totalorder %v1189_v47, 127 }
  0x41   : > { %857 = vmatpush3.bf16.msra.mxu1 %v946_v49 }
  0xf7   : > { %v828_v51 = vpop.f32.mrb[0].mxu1 }
  0xf8   : > { %v347_v52 = vadd.f32 %v828_v51, %v766_v50  ;;  %v338_v53 = vpop.f32.mrb[1].mxu1 }
  0xf9   : > { %v339_v54 = vadd.f32 %v766_v50, %v338_v53  ;;  %v829_v55 = vpop.f32.mrb[2].mxu1 }
  0xfa   : > { %v350_v56 = vadd.f32 %v829_v55, %v766_v50  ;;  %v341_v57 = vpop.f32.mrb[3].mxu1  ;;  %v403_v59 = vmax.f32 %v347_v52, 0.0 }
  0xfb   : > { %v342_v58 = vadd.f32 %v766_v50, %v341_v57  ;;  %v401_v61 = vmax.f32 %v339_v54, 0.0 }
  0xfc   : > { %v404_v60 = vmax.f32 %v350_v56, 0.0 }
  0xfd   : > { %v402_v62 = vmax.f32 %v342_v58, 0.0 }
  0xfe   : > { %v418_v63 = vpack.c.bf16 %v404_v60, %v403_v59 }
  0xff   : > { %v417_v0 = vpack.c.bf16 %v402_v62, %v401_v61  ;;  %v832_v2 = vpop.f32.mrb[4].mxu1 }
 0x100   : > { %v363_v3 = vadd.f32 %v832_v2, %v766_v50  ;;  %v354_v4 = vpop.f32.mrb[5].mxu1 }
 0x101   : > { %v355_v5 = vadd.f32 %v766_v50, %v354_v4  ;;  %858 = vmatprep.mubr.bf16.mxu1 %v417_v0  ;;  %v833_v6 = vpop.f32.mrb[6].mxu1 }
 0x102   : > { %v407_v7 = vmax.f32 %v363_v3, 0.0  ;;  %v366_v8 = vadd.f32 %v833_v6, %v766_v50  ;;  %859 = vmatmul.mubr.bf16.vlgmr.msra.gmra.mrb[16].mxu1 %v418_v63  ;;  %v357_v9 = vpop.f32.mrb[7].mxu1 }
 0x103   : > { %v405_v10 = vmax.f32 %v355_v5, 0.0  ;;  %v358_v11 = vadd.f32 %v766_v50, %v357_v9 }
 0x104   : > { %v408_v12 = vmax.f32 %v366_v8, 0.0 }
 0x105   : > { %v406_v13 = vmax.f32 %v358_v11, 0.0 }
 0x106   : > { %v420_v14 = vpack.c.bf16 %v408_v12, %v407_v7 }
 0x107   : > { %v419_v15 = vpack.c.bf16 %v406_v13, %v405_v10  ;;  %v836_v16 = vpop.f32.mrb[8].mxu1 }
 0x108   : > { %v379_v17 = vadd.f32 %v836_v16, %v766_v50  ;;  %v370_v18 = vpop.f32.mrb[9].mxu1 }
 0x109   : > { %862 = vmatprep.mubr.bf16.mxu1 %v419_v15  ;;  %v371_v19 = vadd.f32 %v766_v50, %v370_v18  ;;  %v837_v20 = vpop.f32.mrb[10].mxu1 }
 0x10a   : > { %863 = vmatmul.mubr.bf16.gmra.mrb[20].mxu1 %v420_v14  ;;  %v411_v21 = vmax.f32 %v379_v17, 0.0  ;;  %v382_v22 = vadd.f32 %v837_v20, %v766_v50  ;;  %v373_v23 = vpop.f32.mrb[11].mxu1 }
 0x10b   : > { %v409_v24 = vmax.f32 %v371_v19, 0.0  ;;  %v374_v25 = vadd.f32 %v766_v50, %v373_v23 }
 0x10c   : > { %v412_v26 = vmax.f32 %v382_v22, 0.0 }
 0x10d   : > { %v410_v27 = vmax.f32 %v374_v25, 0.0 }
 0x10e   : > { %v422_v28 = vpack.c.bf16 %v412_v26, %v411_v21 }
 0x10f   : > { %v421_v29 = vpack.c.bf16 %v410_v27, %v409_v24  ;;  %v840_v30 = vpop.f32.mrb[12].mxu1 }
 0x110   : > { %v395_v31 = vadd.f32 %v840_v30, %v766_v50  ;;  %v386_v32 = vpop.f32.mrb[13].mxu1 }
 0x111   : > { %866 = vmatprep.mubr.bf16.mxu1 %v421_v29  ;;  %v387_v33 = vadd.f32 %v766_v50, %v386_v32  ;;  %v841_v34 = vpop.f32.mrb[14].mxu1 }
 0x112   : > { %867 = vmatmul.mubr.bf16.gmra.mrb[24].mxu1 %v422_v28  ;;  %v415_v35 = vmax.f32 %v395_v31, 0.0  ;;  %v398_v36 = vadd.f32 %v841_v34, %v766_v50  ;;  %v389_v37 = vpop.f32.mrb[15].mxu1 }
 0x113   : > { %v413_v38 = vmax.f32 %v387_v33, 0.0  ;;  %v390_v39 = vadd.f32 %v766_v50, %v389_v37 }
 0x114   : > { %v416_v40 = vmax.f32 %v398_v36, 0.0 }
 0x115   : > { %v414_v41 = vmax.f32 %v390_v39, 0.0 }
 0x116   : > { %v424_v42 = vpack.c.bf16 %v416_v40, %v415_v35 }
 0x117   : > { %v423_v43 = vpack.c.bf16 %v414_v41, %v413_v38 }
 0x119   : > { %870 = vmatprep.mubr.bf16.mxu1 %v423_v43 }
 0x11a   : > { %871 = vmatmul.mubr.bf16.gmra.mrb[28].mxu1 %v424_v42 }
 0x1d5   : > { %v860_v46 = vpop.f32.mrb[16].mxu1 }
 0x1d6   : > { %v520_v48 = vadd.f32 %v860_v46, %v1187_v45  ;;  %v511_v49 = vpop.f32.mrb[17].mxu1 }
 0x1d7   : > { %v512_v50 = vadd.f32 %v1187_v45, %v511_v49  ;;  %v861_v51 = vpop.f32.mrb[18].mxu1 }
 0x1d8   : > { %v576_v52 = vmax.f32 %v520_v48, 0.0  ;;  %v523_v53 = vadd.f32 %v861_v51, %v1187_v45  ;;  %v514_v54 = vpop.f32.mrb[19].mxu1 }
 0x1d9   : > { %v574_v55 = vmax.f32 %v512_v50, 0.0  ;;  %v515_v56 = vadd.f32 %v1187_v45, %v514_v54 }
 0x1da   : > { %v577_v57 = vmax.f32 %v523_v53, 0.0  ;;  %v595_v59 = vsel %vm592_vm3, 1.0, %v576_v52 }
 0x1db   : > { %v575_v58 = vmax.f32 %v515_v56, 0.0  ;;  %v593_v62 = vsel %vm592_vm3, 1.0, %v574_v55 }
 0x1dc   : > { %v596_v60 = vsel %vm592_vm3, 1.0, %v577_v57 }
 0x1dd   : > { %v864_v61 = vpop.f32.mrb[20].mxu1  ;;  %v594_v63 = vsel %vm592_vm3, 1.0, %v575_v58  ;;  %v610_v0 = vpack.c.bf16 %v596_v60, %v595_v59 }
 0x1de   : > { %v536_v2 = vadd.f32 %v864_v61, %v1187_v45  ;;  %v527_v3 = vpop.f32.mrb[21].mxu1  ;;  %v609_v4 = vpack.c.bf16 %v594_v63, %v593_v62 }
 0x1df   : > { %v528_v5 = vadd.f32 %v1187_v45, %v527_v3  ;;  %v865_v6 = vpop.f32.mrb[22].mxu1 }
 0x1e0   : > { %v580_v7 = vmax.f32 %v536_v2, 0.0  ;;  %v539_v8 = vadd.f32 %v865_v6, %v1187_v45  ;;  %875 = vmatpush3.bf16.xpose.msra.mxu0 %v609_v4  ;;  %v530_v9 = vpop.f32.mrb[23].mxu1 }
 0x1e1   : > { %v578_v10 = vmax.f32 %v528_v5, 0.0  ;;  %v531_v11 = vadd.f32 %v1187_v45, %v530_v9  ;;  %876 = vmatprep.subr.bf16.mxu0 %v1012_v1 }
 0x1e2   : > { %v599_v12 = vsel %vm592_vm3, 1.0, %v580_v7  ;;  %v581_v13 = vmax.f32 %v539_v8, 0.0 }
 0x1e3   : > { %v597_v14 = vsel %vm592_vm3, 1.0, %v578_v10  ;;  %v579_v15 = vmax.f32 %v531_v11, 0.0 }
 0x1e4   : > { %v600_v16 = vsel %vm592_vm3, 1.0, %v581_v13 }
 0x1e5   : > { %v598_v17 = vsel %vm592_vm3, 1.0, %v579_v15  ;;  %v868_v18 = vpop.f32.mrb[24].mxu1  ;;  %v612_v19 = vpack.c.bf16 %v600_v16, %v599_v12 }
 0x1e6   : > { %v552_v20 = vadd.f32 %v868_v18, %v1187_v45  ;;  %v543_v21 = vpop.f32.mrb[25].mxu1  ;;  %v611_v22 = vpack.c.bf16 %v598_v17, %v597_v14 }
 0x1e7   : > { %v544_v23 = vadd.f32 %v1187_v45, %v543_v21  ;;  %v869_v24 = vpop.f32.mrb[26].mxu1 }
 0x1e8   : > { %877 = vmatpush3.bf16.xpose.msra.mxu0 %v610_v0  ;;  %v584_v25 = vmax.f32 %v552_v20, 0.0  ;;  %v555_v26 = vadd.f32 %v869_v24, %v1187_v45  ;;  %v546_v27 = vpop.f32.mrb[27].mxu1 }
 0x1e9   : > { %v582_v28 = vmax.f32 %v544_v23, 0.0  ;;  %878 = vmatprep.subr.bf16.mxu0 %v1012_v1  ;;  %v547_v29 = vadd.f32 %v1187_v45, %v546_v27 }
 0x1ea   : > { %v603_v30 = vsel %vm592_vm3, 1.0, %v584_v25  ;;  %v585_v31 = vmax.f32 %v555_v26, 0.0 }
 0x1eb   : > { %v601_v32 = vsel %vm592_vm3, 1.0, %v582_v28  ;;  %v583_v33 = vmax.f32 %v547_v29, 0.0 }
 0x1ec   : > { %v604_v34 = vsel %vm592_vm3, 1.0, %v585_v31 }
 0x1ed   : > { %v602_v35 = vsel %vm592_vm3, 1.0, %v583_v33  ;;  %v872_v36 = vpop.f32.mrb[28].mxu1  ;;  %v614_v37 = vpack.c.bf16 %v604_v34, %v603_v30 }
 0x1ee   : > { %v568_v38 = vadd.f32 %v872_v36, %v1187_v45  ;;  %v559_v39 = vpop.f32.mrb[29].mxu1  ;;  %v613_v40 = vpack.c.bf16 %v602_v35, %v601_v32 }
 0x1ef   : > { %v560_v41 = vadd.f32 %v1187_v45, %v559_v39  ;;  %v873_v42 = vpop.f32.mrb[30].mxu1 }
 0x1f0   : > { %879 = vmatpush3.bf16.xpose.msra.mxu0 %v611_v22  ;;  %v588_v43 = vmax.f32 %v568_v38, 0.0  ;;  %v571_v44 = vadd.f32 %v873_v42, %v1187_v45  ;;  %v562_v46 = vpop.f32.mrb[31].mxu1 }
 0x1f1   : > { %880 = vmatprep.subr.bf16.mxu0 %v1012_v1  ;;  %v586_v48 = vmax.f32 %v560_v41, 0.0  ;;  %v563_v49 = vadd.f32 %v1187_v45, %v562_v46  ;;  %v947_v45 = vld [vmem:[%s1301_s1 + $0x80] sm:$0xff]  }
 0x1f2   : > { %v607_v50 = vsel %vm592_vm3, 1.0, %v588_v43  ;;  %v589_v51 = vmax.f32 %v571_v44, 0.0 }
 0x1f3   : > { %v605_v52 = vsel %vm592_vm3, 1.0, %v586_v48  ;;  %v587_v53 = vmax.f32 %v563_v49, 0.0 }
 0x1f4   : > { %v608_v54 = vsel %vm592_vm3, 1.0, %v589_v51 }
 0x1f5   : > { %v606_v55 = vsel %vm592_vm3, 1.0, %v587_v53  ;;  %v616_v56 = vpack.c.bf16 %v608_v54, %v607_v50 }
 0x1f6   : > { %v615_v57 = vpack.c.bf16 %v606_v55, %v605_v52 }
 0x1f8   : > { %881 = vmatpush3.bf16.xpose.msra.mxu0 %v612_v19 }
 0x1f9   : > { %882 = vmatprep.subr.bf16.mxu0 %v1012_v1 }
 0x200   : > { %883 = vmatpush3.bf16.xpose.msra.mxu0 %v613_v40 }
 0x201   : > { %884 = vmatprep.subr.bf16.mxu0 %v1012_v1 }
 0x208   : > { %885 = vmatpush3.bf16.xpose.msra.mxu0 %v614_v37 }
 0x209   : > { %886 = vmatprep.subr.bf16.mxu0 %v1012_v1 }
 0x210   : > { %887 = vmatpush3.bf16.xpose.msra.mxu0 %v615_v57 }
 0x211   : > { %888 = vmatprep.subr.bf16.mxu0 %v1012_v1 }
 0x218   : > { %889 = vmatpush3.bf16.xpose.msra.mxu0 %v616_v56 }
 0x21f   : > { %891 = vmatmul.mubr.bf16.vlgmr.msra.gmra.mrb[0].mxu0 %v947_v45 }
 0x2f2   : > { %v657_v47 = vpop.f32.mrb[0].mxu0 }
 0x2f3   : > { %664 = vst [vmem:[%s164_s11] sm:$0xff] %v657_v47  ;;  %v892_v1 = vpop.f32.mrb[1].mxu0 }
 0x2f4   : > { %v660_v58 = vpop.f32.mrb[2].mxu0 }
 0x2f5   : > { %665 = vst [vmem:[%s164_s11 + $0x8] sm:$0xff] %v660_v58  ;;  %v893_v59 = vpop.f32.mrb[3].mxu0 }
 0x2f6   : > { %961 = shalt.err (!%p958_p3)
}
 0x2f7   : > { %s962_s30 = scalar_lea.hbm %s1257_s25, 256  ;;  %s966_s6 = scalar_lea.hbm %s1303_s3, 512 }
 0x2f8   : > { %p963_p4 = scmp.ne.s32.totalorder %s1257_s25, %s962_s30  ;;  %p967_p9 = scmp.lt.u32.totalorder %s1257_s25, %s1303_s3 }
 0x2f9   : > { %p968_p10 = scmp.lt.u32.totalorder %s966_s6, %s962_s30  ;;  %p970_p12 = scmp.lt.u32.totalorder %s962_s30, %s1257_s25 }
 0x2fa   : > { %p964_p7 = pnand %p963_p4, %p1076_p5 }
 0x2fb   : > { %p969_p11 = por %p968_p10, %p967_p9 }
 0x2fc   : > { %p965_p8 = pneg %p964_p7 }
 0x2fd   : > { %p971_p13 = por %p970_p12, %p969_p11 }
 0x2ff   : > { %p972_p0 = pnand %p971_p13, %p965_p8 }
 0x301   : > { %975 = shalt.err (!%p972_p0)
}
 0x302   : > { %s1015_s9 = smov 128   ;;  %s1016_s10 = smov 256  }
 0x303   : > { %s1017_s11 = smov 8  }
 0x304   : > { %894 = dma.vmem_to_hbm [thread:$0]  (%p1076_p5), %s1252_s17, 256, %s1257_s25, %s1259_s26, %s1015_s9, %s1016_s10, %s1017_s11  }
 0x305 PF: > { %p900_p1 = scmp.ge.s32.totalorder %s1010_s15, 2  ;;  %s694_s19 = sand.u32 1, %s998_s12  }
 0x306   : > { %s695_s20 = scalar_lea.sflag [#allocation4], %s694_s19 }
 0x307   : > { %p897_p2 = pnand %p900_p1, %p1080_p6 }
 0x309   : > { %993 = dma.done.wait (!%p897_p2), %s695_s20, 256  }
 0x30a   : > { %995 = vsyncadd (!%p897_p2), %s695_s20, 4294967040  ;;  %p13_p3 = scmp.ge.s32.totalorder %s1063_s18, 4   ;;  %s1307_s12 = smov %s1002_s13 }
 0x30b   : > { %s1308_s13 = smov %s1006_s14  ;;  %s1309_s14 = smov %s1074_s21 }
 0x30c   : > { %s1310_s15 = smov %s1063_s18  ;;  %15 = sbr.rel (!%p13_p3) target bundleno = 3 (0x3), region = 69 }
 0x313   :  { %700 = vsyncpa [#allocation4], 1 }
 0x314   :  { %702 = vsyncpa [#allocation4 + $0x1], 1 }

</bundles_post_ra>
